<compile_context>
chip_gen: v7x
topology: tpu7x:2x2x1
jax: 0.10.0
libtpu: 0.0.40
codegen_flags: <defaults>
</compile_context>

<pallas_src>
import functools
import math

import jax
import jax.numpy as jnp
from jax.experimental import pallas as pl
from jax.experimental.pallas import tpu as pltpu

NDF = 64
LRELU_SLOPE = 0.2
BN_EPS = 1e-5

# Base tile sizes (clamped to actual problem size); sized to stay well inside
# the scoped-VMEM defaults of every generation (v5e 16 MiB ... v7x 32 MiB).
_TM_BASE = 512
_TN_BASE = 256
_TK_BASE = 512
_TR_BASE = 1024                       # row tile for the BN kernels
_VMEM_LIMIT = 48 * 1024 * 1024        # < v7x 64 MiB physical, > v5e 16 MiB default


def _round_up(x, m):
    return ((x + m - 1) // m) * m


# ----------------------------------------------------------------------------
# Pallas kernels
# ----------------------------------------------------------------------------
def _matmul_kernel(a_ref, b_ref, o_ref, acc_ref, *, activation):
    """Tiled bf16 matmul with f32 accumulator and fused activation epilogue."""
    k = pl.program_id(2)

    @pl.when(k == 0)
    def _():
        acc_ref[...] = jnp.zeros_like(acc_ref)

    acc_ref[...] += jnp.dot(a_ref[...], b_ref[...],
                            preferred_element_type=jnp.float32)

    @pl.when(k == pl.num_programs(2) - 1)
    def _():
        acc = acc_ref[...]
        if activation == "leaky":
            acc = jnp.where(acc > 0, acc, LRELU_SLOPE * acc)
        elif activation == "sigmoid":
            acc = jax.nn.sigmoid(acc)          # exp + reciprocal on the EUP
        # activation == "none": raw conv output (feeds the BatchNorm kernels)
        o_ref[...] = acc.astype(o_ref.dtype)


def _bn_stats_kernel(x_ref, sum_ref, sq_ref):
    """One-pass per-channel sum / sum-of-squares over row tiles (f32)."""
    i = pl.program_id(0)

    @pl.when(i == 0)
    def _():
        sum_ref[...] = jnp.zeros_like(sum_ref)
        sq_ref[...] = jnp.zeros_like(sq_ref)

    x = x_ref[...]
    sum_ref[...] += jnp.sum(x, axis=0, keepdims=True)
    sq_ref[...] += jnp.sum(x * x, axis=0, keepdims=True)


def _bn_apply_kernel(x_ref, scale_ref, shift_ref, o_ref):
    """y = x * scale + shift, then LeakyReLU(0.2). scale/shift fold mean/var/γ/β."""
    y = x_ref[...] * scale_ref[...] + shift_ref[...]
    o_ref[...] = jnp.where(y > 0, y, LRELU_SLOPE * y)


# ----------------------------------------------------------------------------
# Wrappers (glue: im2col / padding / reshapes in plain JAX, compute in Pallas)
# ----------------------------------------------------------------------------
def _im2col(x, ksize, stride, pad):
    """x: [N, H, W, C] NHWC -> patches [N*OH*OW, C*ksize*ksize] in (ci,kh,kw)
    order (matches PyTorch weight [Cout, Cin, KH, KW] flattening)."""
    n, h, w, c = x.shape
    if pad:
        x = jnp.pad(x, ((0, 0), (pad, pad), (pad, pad), (0, 0)))
    hp, wp = h + 2 * pad, w + 2 * pad
    oh = (hp - ksize) // stride + 1
    ow = (wp - ksize) // stride + 1
    cols = jnp.stack(
        [x[:, i:i + stride * oh:stride, j:j + stride * ow:stride, :]
         for i in range(ksize) for j in range(ksize)],
        axis=-1,
    )                                                     # [N, OH, OW, C, K*K]
    patches = cols.reshape(n * oh * ow, c * ksize * ksize)
    return patches, oh, ow


def _pallas_matmul_act(patches, w_flat, activation):
    """patches [M,K] @ w_flat [K,N] with fused activation; returns f32 [M,N]."""
    m, k = patches.shape
    k2, n = w_flat.shape
    assert k == k2

    tm = min(_TM_BASE, _round_up(m, 16))       # 16: bf16 sublane packing
    tn = min(_TN_BASE, _round_up(n, 128))      # lane-dense output (Cout=1 -> 128)
    tk = min(_TK_BASE, _round_up(k, 128))
    mp, np_, kp = _round_up(m, tm), _round_up(n, tn), _round_up(k, tk)

    a = jnp.pad(patches.astype(jnp.bfloat16), ((0, mp - m), (0, kp - k)))
    b = jnp.pad(w_flat.astype(jnp.bfloat16), ((0, kp - k), (0, np_ - n)))

    kernel = functools.partial(_matmul_kernel, activation=activation)
    out = pl.pallas_call(
        kernel,
        out_shape=jax.ShapeDtypeStruct((mp, np_), jnp.float32),
        grid=(mp // tm, np_ // tn, kp // tk),
        in_specs=[
            pl.BlockSpec((tm, tk), lambda i, j, kk: (i, kk)),
            pl.BlockSpec((tk, tn), lambda i, j, kk: (kk, j)),
        ],
        out_specs=pl.BlockSpec((tm, tn), lambda i, j, kk: (i, j)),
        scratch_shapes=[pltpu.VMEM((tm, tn), jnp.float32)],
        compiler_params=pltpu.CompilerParams(
            dimension_semantics=("parallel", "parallel", "arbitrary"),
            vmem_limit_bytes=_VMEM_LIMIT),
    )(a, b)
    return out[:m, :n]


def _pallas_batchnorm_lrelu(x2d, gamma, beta):
    """BatchNorm2d (training-mode biased batch stats over rows) + LeakyReLU.

    x2d: [R, C] f32 with R = N*OH*OW.  gamma/beta: [1, C].
    """
    r, c = x2d.shape
    cpad = _round_up(c, 128)
    tr = min(_TR_BASE, _round_up(r, 8))
    rpad = _round_up(r, tr)
    xp = jnp.pad(x2d, ((0, rpad - r), (0, cpad - c)))   # zero rows/cols: no effect

    # Pass 1: per-channel sum and sum-of-squares (output-resident accumulators).
    s, sq = pl.pallas_call(
        _bn_stats_kernel,
        out_shape=(jax.ShapeDtypeStruct((1, cpad), jnp.float32),
                   jax.ShapeDtypeStruct((1, cpad), jnp.float32)),
        grid=(rpad // tr,),
        in_specs=[pl.BlockSpec((tr, cpad), lambda i: (i, 0))],
        out_specs=(pl.BlockSpec((1, cpad), lambda i: (0, 0)),
                   pl.BlockSpec((1, cpad), lambda i: (0, 0))),
        compiler_params=pltpu.CompilerParams(
            dimension_semantics=("arbitrary",),
            vmem_limit_bytes=_VMEM_LIMIT),
    )(xp)

    # Tiny per-channel math in plain JAX (f32; guard E[x^2]-E[x]^2 cancellation).
    inv_r = 1.0 / r
    mean = s * inv_r
    var = jnp.maximum(sq * inv_r - mean * mean, 0.0)
    gp = jnp.pad(gamma, ((0, 0), (0, cpad - c)), constant_values=1.0)
    bp = jnp.pad(beta, ((0, 0), (0, cpad - c)))
    scale = gp * jax.lax.rsqrt(var + BN_EPS)
    shift = bp - mean * scale

    # Pass 2: tiled elementwise normalize + affine + LeakyReLU.
    out = pl.pallas_call(
        _bn_apply_kernel,
        out_shape=jax.ShapeDtypeStruct((rpad, cpad), jnp.float32),
        grid=(rpad // tr,),
        in_specs=[pl.BlockSpec((tr, cpad), lambda i: (i, 0)),
                  pl.BlockSpec((1, cpad), lambda i: (0, 0)),
                  pl.BlockSpec((1, cpad), lambda i: (0, 0))],
        out_specs=pl.BlockSpec((tr, cpad), lambda i: (i, 0)),
        compiler_params=pltpu.CompilerParams(
            dimension_semantics=("parallel",),
            vmem_limit_bytes=_VMEM_LIMIT),
    )(xp, scale, shift)
    return out[:r, :c]


def _conv_layer(x_nhwc, w_oihw, stride, pad, activation):
    """Conv2d(ksize=4, bias=False) + fused activation via im2col + Pallas matmul."""
    cout, cin, kh, kw = w_oihw.shape
    n = x_nhwc.shape[0]
    # Emit the (16x-duplicated) patch matrix in bf16 to halve its HBM footprint.
    patches, oh, ow = _im2col(x_nhwc.astype(jnp.bfloat16), kh, stride, pad)
    w_flat = jnp.transpose(w_oihw.reshape(cout, cin * kh * kw))   # [Cin*K*K, Cout]
    out = _pallas_matmul_act(patches, w_flat, activation)         # f32
    return out.reshape(n, oh, ow, cout)


def discriminator_forward(x_nchw, w_first, mid_params, w_last):
    """Forward pass matching the PyTorch Discriminator."""
    x = jnp.transpose(x_nchw, (0, 2, 3, 1)).astype(jnp.float32)   # NCHW -> NHWC
    # first conv (stride 2, pad 1) + LeakyReLU(0.2)
    x = _conv_layer(x, w_first, stride=2, pad=1, activation="leaky")
    # mid layers: conv (stride 2, pad 1) -> BatchNorm2d -> LeakyReLU(0.2)
    for (w, gamma, beta) in mid_params:
        x = _conv_layer(x, w, stride=2, pad=1, activation="none")
        n, oh, ow, c = x.shape
        x = _pallas_batchnorm_lrelu(x.reshape(n * oh * ow, c), gamma, beta)
        x = x.reshape(n, oh, ow, c)
    # final conv (stride 1, pad 0) + Sigmoid
    x = _conv_layer(x, w_last, stride=1, pad=0, activation="sigmoid")
    # output.view(-1, 1).squeeze(1): the final conv must reduce spatial to 1x1.
    assert x.shape[1] == 1 and x.shape[2] == 1 and x.shape[3] == 1, x.shape
    return x.reshape(-1)


# ----------------------------------------------------------------------------
# Deterministic parameter construction (shapes follow Discriminator.__init__)
# ----------------------------------------------------------------------------
def make_params(key, image_size, image_channels):
    mid_layer_count = int(math.log(image_size / 16, 2) + 1)
    keys = jax.random.split(key, mid_layer_count + 2)
    # first conv: (NDF, image_channels, 4, 4), init N(0, 0.02) like init_weights
    w_first = 0.02 * jax.random.normal(
        keys[0], (NDF, image_channels, 4, 4), jnp.float32)
    mid_params = []
    out_ch = NDF
    for i in range(mid_layer_count):
        in_ch = out_ch
        out_ch = int(NDF * 2 ** (i + 1))
        w = 0.02 * jax.random.normal(keys[i + 1], (out_ch, in_ch, 4, 4),
                                     jnp.float32)
        gamma = jnp.ones((1, out_ch), jnp.float32)   # nn.BatchNorm2d default weight
        beta = jnp.zeros((1, out_ch), jnp.float32)   # nn.BatchNorm2d default bias
        mid_params.append((w, gamma, beta))
    w_last = 0.02 * jax.random.normal(keys[-1], (1, out_ch, 4, 4), jnp.float32)
    return w_first, mid_params, w_last


if __name__ == "__main__":
    IMAGE_SIZE = 16        # smallest size the module supports (mid_layer_count = 1)
    IMAGE_CHANNELS = 3
    BATCH = 2

    key = jax.random.PRNGKey(0)
    k_params, k_x = jax.random.split(key)
    w_first, mid_params, w_last = make_params(k_params, IMAGE_SIZE, IMAGE_CHANNELS)
    x = jax.random.normal(k_x, (BATCH, IMAGE_CHANNELS, IMAGE_SIZE, IMAGE_SIZE),
                          jnp.float32)

    out = discriminator_forward(x, w_first, mid_params, w_last)
    out = jax.block_until_ready(out)

    assert out.shape == (BATCH,), out.shape
    assert bool(jnp.all((out >= 0.0) & (out <= 1.0)))
    print("KERNEL_OK")
</pallas_src>

<mosaic_0001>
module attributes {stable_mosaic.version = 11 : i64} {
  func.func @_matmul_kernel(%arg0: i32, %arg1: i32, %arg2: i32, %arg3: memref<128x128xbf16, #tpu.memory_space<vmem>>, %arg4: memref<128x128xbf16, #tpu.memory_space<vmem>>, %arg5: memref<128x128xf32, #tpu.memory_space<vmem>>, %arg6: memref<128x128xf32, #tpu.memory_space<vmem>>) attributes {dimension_semantics = [#tpu.dimension_semantics<parallel>, #tpu.dimension_semantics<parallel>, #tpu.dimension_semantics<arbitrary>], iteration_bounds = array<i64: 1, 1, 1>, scalar_prefetch = 0 : i64, scratch_operands = 1 : i64, tpu.core_type = #tpu.core_type<tc>, window_params = [{transform_indices = @transform_0, window_bounds = array<i64: 128, 128>}, {transform_indices = @transform_1, window_bounds = array<i64: 128, 128>}, {transform_indices = @transform_2, window_bounds = array<i64: 128, 128>}]} {
    %c0_i32 = arith.constant 0 : i32
    %0 = arith.cmpi eq, %arg2, %c0_i32 : i32
    %1 = arith.extui %0 : i1 to i32
    %c0_i32_0 = arith.constant 0 : i32
    %2 = arith.cmpi ne, %1, %c0_i32_0 : i32
    scf.if %2 {
      %cst_10 = arith.constant 0.000000e+00 : f32
      %12 = vector.broadcast %cst_10 : f32 to vector<128x128xf32>
      %c0_11 = arith.constant 0 : index
      %c0_12 = arith.constant 0 : index
      %13 = vector.load %arg6[%c0_11, %c0_12] : memref<128x128xf32, #tpu.memory_space<vmem>>, vector<128x128xf32>
      tpu.vector_store %arg6[%c0_11, %c0_12], %12 {strides = array<i32>} : memref<128x128xf32, #tpu.memory_space<vmem>>, vector<128x128xf32>,
    } else {
    }
    %c0 = arith.constant 0 : index
    %c0_1 = arith.constant 0 : index
    %3 = vector.load %arg6[%c0, %c0_1] : memref<128x128xf32, #tpu.memory_space<vmem>>, vector<128x128xf32>
    %c0_2 = arith.constant 0 : index
    %c0_3 = arith.constant 0 : index
    %4 = vector.load %arg3[%c0_2, %c0_3] : memref<128x128xbf16, #tpu.memory_space<vmem>>, vector<128x128xbf16>
    %c0_4 = arith.constant 0 : index
    %c0_5 = arith.constant 0 : index
    %5 = vector.load %arg4[%c0_4, %c0_5] : memref<128x128xbf16, #tpu.memory_space<vmem>>, vector<128x128xbf16>
    %cst = arith.constant dense<0.000000e+00> : vector<128x128xf32>
    %6 = tpu.matmul %4, %5, %cst {dimension_numbers = #tpu.dot_dimension_numbers<[1], [0], [0], [1], [0, 0, 1, 1], [], []>} : vector<128x128xbf16>, vector<128x128xbf16>, vector<128x128xf32> -> vector<128x128xf32>
    %7 = arith.addf %3, %6 : vector<128x128xf32>
    %c0_6 = arith.constant 0 : index
    %c0_7 = arith.constant 0 : index
    %8 = vector.load %arg6[%c0_6, %c0_7] : memref<128x128xf32, #tpu.memory_space<vmem>>, vector<128x128xf32>
    tpu.vector_store %arg6[%c0_6, %c0_7], %7 {strides = array<i32>} : memref<128x128xf32, #tpu.memory_space<vmem>>, vector<128x128xf32>,
    %c0_i32_8 = arith.constant 0 : i32
    %9 = arith.cmpi eq, %arg2, %c0_i32_8 : i32
    %10 = arith.extui %9 : i1 to i32
    %c0_i32_9 = arith.constant 0 : i32
    %11 = arith.cmpi ne, %10, %c0_i32_9 : i32
    scf.if %11 {
      %c0_10 = arith.constant 0 : index
      %c0_11 = arith.constant 0 : index
      %12 = vector.load %arg6[%c0_10, %c0_11] : memref<128x128xf32, #tpu.memory_space<vmem>>, vector<128x128xf32>
      %cst_12 = arith.constant 0.000000e+00 : f32
      %13 = vector.broadcast %cst_12 : f32 to vector<128x128xf32>
      %14 = arith.cmpf ogt, %12, %13 : vector<128x128xf32>
      %cst_13 = arith.constant 2.000000e-01 : f32
      %15 = vector.broadcast %cst_13 : f32 to vector<128x128xf32>
      %16 = arith.mulf %15, %12 : vector<128x128xf32>
      %17 = arith.select %14, %12, %16 : vector<128x128xi1>, vector<128x128xf32>
      %c0_14 = arith.constant 0 : index
      %c0_15 = arith.constant 0 : index
      %18 = vector.load %arg5[%c0_14, %c0_15] : memref<128x128xf32, #tpu.memory_space<vmem>>, vector<128x128xf32>
      tpu.vector_store %arg5[%c0_14, %c0_15], %17 {strides = array<i32>} : memref<128x128xf32, #tpu.memory_space<vmem>>, vector<128x128xf32>,
    } else {
    }
    return
  }
  func.func @transform_0(%arg0: i32, %arg1: i32, %arg2: i32) -> (i32, i32) {
    %c0_i32 = arith.constant 0 : i32
    return %arg0, %arg2 : i32, i32
  }
  func.func @transform_1(%arg0: i32, %arg1: i32, %arg2: i32) -> (i32, i32) {
    %c0_i32 = arith.constant 0 : i32
    return %arg2, %arg1 : i32, i32
  }
  func.func @transform_2(%arg0: i32, %arg1: i32, %arg2: i32) -> (i32, i32) {
    %c0_i32 = arith.constant 0 : i32
    return %arg0, %arg1 : i32, i32
  }
}

</mosaic_0001>

<bundles_post_ra>
// kernel: tpu_custom_call.1
= control target key start
LH: loop header
LB: loop body
LE: loop exit
PB: predicated region body
PF: predicated region fallthrough
CT: control target
= control target key end

     0   :  { %7 = vsyncpa [#allocation4], 0  ;;  %s669_s0 = inlined_call_operand.hbm [shape: bf16[128,128], index: 0, kind: input, shape index: {}]   ;;  %s670_s1 = inlined_call_operand.hbm [shape: bf16[128,128], index: 1, kind: input, shape index: {}]   ;;  %s671_s2 = inlined_call_operand.hbm [shape: f32[128,128], index: 2, kind: output, shape index: {}]  }
   0x1   :  { %8 = vsyncpa [#allocation7], 0 }
   0x2   :  { %9 = vsyncpa [#allocation5], 0  ;;  %s610_s9 = smov [#allocation3]   ;;  %s538_s13 = scalar_lea.hbm %s669_s0, 1024 }
   0x3   :  { %s15_s10 = sshll.u32 %s610_s9, 4  ;;  %p539_p0 = scmp.ne.s32.totalorder %s669_s0, %s538_s13  ;;  %s16_s10 = int_to_ptr.vmem [resolvable:$true] %s15_s10 }
   0x4   :  { %p542_p1 = scmp.lt.u32.totalorder %s538_s13, %s669_s0 }
   0x6   :  { %p544_p2 = pnand %p542_p1, %p539_p0 }
   0x8   :  { %547 = shalt.err (!%p544_p2)
}
   0x9   :  { %s548_s18 = scalar_lea.vmem %s16_s10, 1024  ;;  %p553_p4 = scmp.lt.s32.totalorder %s16_s10, %s16_s10 }
   0xa   :  { %p549_p3 = scmp.ne.s32.totalorder %s16_s10, %s548_s18  ;;  %p554_p5 = scmp.lt.s32.totalorder %s548_s18, %s548_s18 }
   0xc   :  { %p555_p6 = por %p554_p5, %p553_p4 }
   0xe   :  { %p556_p7 = pnand %p555_p6, %p549_p3 }
  0x10   :  { %559 = shalt.err (!%p556_p7)
}
  0x11   :  { %s611_s19 = smov 64   ;;  %s612_s20 = smov 4  }
  0x12   :  { %21 = dma.hbm_to_vmem [thread:$0]  %s669_s0, 1024, %s16_s10, [#allocation4], %s611_s19, %s611_s19, %s612_s20  }
  0x13   :  { %s613_s23 = smov [#allocation6]   ;;  %s560_s27 = scalar_lea.hbm %s670_s1, 1024 }
  0x14   :  { %s27_s24 = sshll.u32 %s613_s23, 4  ;;  %p561_p8 = scmp.ne.s32.totalorder %s670_s1, %s560_s27  ;;  %s28_s24 = int_to_ptr.vmem [resolvable:$true] %s27_s24 }
  0x15   :  { %p564_p9 = scmp.lt.u32.totalorder %s560_s27, %s670_s1 }
  0x17   :  { %p566_p10 = pnand %p564_p9, %p561_p8 }
  0x19   :  { %569 = shalt.err (!%p566_p10)
}
  0x1a   :  { %s570_s4 = scalar_lea.vmem %s28_s24, 1024  ;;  %p575_p12 = scmp.lt.s32.totalorder %s28_s24, %s28_s24 }
  0x1b   :  { %p571_p11 = scmp.ne.s32.totalorder %s28_s24, %s570_s4  ;;  %p576_p13 = scmp.lt.s32.totalorder %s570_s4, %s570_s4 }
  0x1d   :  { %p577_p0 = por %p576_p13, %p575_p12 }
  0x1f   :  { %p578_p1 = pnand %p577_p0, %p571_p11 }
  0x21   :  { %581 = shalt.err (!%p578_p1)
}
  0x22   :  { %33 = dma.hbm_to_vmem [thread:$0]  %s670_s1, 1024, %s28_s24, [#allocation7], %s611_s19, %s611_s19, %s612_s20  }
  0x23   :  { %604 = dma.done.wait [#allocation4], 1024  }
  0x24   :  { %605 = vsyncadd [#allocation4], 4294966272 }
  0x25   :  { %606 = dma.done.wait [#allocation7], 1024  }
  0x26   :  { %607 = vsyncadd [#allocation7], 4294966272  ;;  %v522_v0 = vld [vmem:[#allocation6] sm:$0xff]   ;;  %v523_v1 = vld [vmem:[#allocation6 + $0x8] sm:$0xff]   ;;  %s614_s1 = smov [#allocation8]  }
  0x27   :  { %467 = vmatprep.subr.bf16.mxu0 %v522_v0  ;;  %499 = vmatprep.subr.bf16.mxu1 %v522_v0  ;;  %v524_v2 = vld [vmem:[#allocation6 + $0x10] sm:$0xff]   ;;  %v525_v3 = vld [vmem:[#allocation6 + $0x18] sm:$0xff]   ;;  %v530_v4 = vld [vmem:[#allocation3] sm:$0xff]   ;;  %s422_s6 = sshll.u32 %s614_s1, 4  ;;  %s423_s6 = int_to_ptr.vmem [resolvable:$true] %s422_s6 }
  0x28   :  { %468 = vmatpush3.bf16.msra.mxu0 %v522_v0  ;;  %507 = vmatpush3.bf16.msra.mxu1 %v522_v0  ;;  %v531_v5 = vld [vmem:[#allocation3 + $0x20] sm:$0xff]   ;;  %v527_v7 = vld [vmem:[#allocation6 + $0x28] sm:$0xff]   ;;  %v528_v8 = vld [vmem:[#allocation6 + $0x30] sm:$0xff]   ;;  %s582_s7 = scalar_lea.vmem %s423_s6, 2048  ;;  %p587_p3 = scmp.lt.s32.totalorder %s423_s6, %s423_s6 }
  0x29   :  { %469 = vmatprep.subr.bf16.mxu0 %v523_v1  ;;  %500 = vmatprep.subr.bf16.mxu1 %v523_v1  ;;  %v526_v6 = vld [vmem:[#allocation6 + $0x20] sm:$0xff]   ;;  %v529_v9 = vld [vmem:[#allocation6 + $0x38] sm:$0xff]   ;;  %v532_v10 = vld [vmem:[#allocation3 + $0x8] sm:$0xff]   ;;  %p583_p2 = scmp.ne.s32.totalorder %s423_s6, %s582_s7  ;;  %p588_p4 = scmp.lt.s32.totalorder %s582_s7, %s582_s7 }
  0x2a   :  { %483 = vmatprep.mubr.bf16.mxu0 %v530_v4  ;;  %491 = vmatprep.mubr.bf16.mxu1 %v531_v5  ;;  %v533_v11 = vld [vmem:[#allocation3 + $0x28] sm:$0xff]   ;;  %v534_v12 = vld [vmem:[#allocation3 + $0x10] sm:$0xff]   ;;  %v536_v14 = vld [vmem:[#allocation3 + $0x18] sm:$0xff]  }
  0x2b   :  { %v535_v13 = vld [vmem:[#allocation3 + $0x30] sm:$0xff]   ;;  %v537_v15 = vld [vmem:[#allocation3 + $0x38] sm:$0xff]   ;;  %p589_p5 = por %p588_p4, %p587_p3 }
  0x2c   :  { %470 = vmatpush3.bf16.msra.mxu0 %v523_v1  ;;  %508 = vmatpush3.bf16.msra.mxu1 %v523_v1 }
  0x2d   :  { %471 = vmatprep.subr.bf16.mxu0 %v524_v2  ;;  %501 = vmatprep.subr.bf16.mxu1 %v524_v2  ;;  %p590_p6 = pnand %p589_p5, %p583_p2 }
  0x30   :  { %472 = vmatpush3.bf16.msra.mxu0 %v524_v2  ;;  %509 = vmatpush3.bf16.msra.mxu1 %v524_v2 }
  0x31   :  { %473 = vmatprep.subr.bf16.mxu0 %v525_v3  ;;  %502 = vmatprep.subr.bf16.mxu1 %v525_v3 }
  0x34   :  { %474 = vmatpush3.bf16.msra.mxu0 %v525_v3  ;;  %510 = vmatpush3.bf16.msra.mxu1 %v525_v3 }
  0x35   :  { %475 = vmatprep.subr.bf16.mxu0 %v526_v6  ;;  %503 = vmatprep.subr.bf16.mxu1 %v526_v6 }
  0x38   :  { %476 = vmatpush3.bf16.msra.mxu0 %v526_v6  ;;  %511 = vmatpush3.bf16.msra.mxu1 %v526_v6 }
  0x39   :  { %477 = vmatprep.subr.bf16.mxu0 %v527_v7  ;;  %504 = vmatprep.subr.bf16.mxu1 %v527_v7 }
  0x3c   :  { %478 = vmatpush3.bf16.msra.mxu0 %v527_v7  ;;  %512 = vmatpush3.bf16.msra.mxu1 %v527_v7 }
  0x3d   :  { %479 = vmatprep.subr.bf16.mxu0 %v528_v8  ;;  %505 = vmatprep.subr.bf16.mxu1 %v528_v8 }
  0x40   :  { %480 = vmatpush3.bf16.msra.mxu0 %v528_v8  ;;  %513 = vmatpush3.bf16.msra.mxu1 %v528_v8 }
  0x41   :  { %481 = vmatprep.subr.bf16.mxu0 %v529_v9  ;;  %506 = vmatprep.subr.bf16.mxu1 %v529_v9 }
  0x44   :  { %482 = vmatpush3.bf16.msra.mxu0 %v529_v9  ;;  %514 = vmatpush3.bf16.msra.mxu1 %v529_v9 }
  0x47   :  { %484 = vmatmul.mubr.bf16.vlgmr.msra.gmra.mrb[0].mxu0 %v532_v10  ;;  %492 = vmatmul.mubr.bf16.vlgmr.msra.gmra.mrb[0].mxu1 %v533_v11 }
  0x48   :  { %487 = vmatprep.mubr.bf16.mxu0 %v534_v12  ;;  %495 = vmatprep.mubr.bf16.mxu1 %v535_v13 }
  0x4f   :  { %488 = vmatmul.mubr.bf16.gmra.mrb[4].mxu0 %v536_v14  ;;  %496 = vmatmul.mubr.bf16.gmra.mrb[4].mxu1 %v537_v15 }
 0x11a   :  { %v485_v16 = vpop.f32.mrb[0].mxu0  ;;  %v493_v17 = vpop.f32.mrb[0].mxu1 }
 0x11b   :  { %vm355_vm0 = vcmp.gt.f32.partialorder %v485_v16, 0.0  ;;  %v371_v18 = vmul.f32 0.2, %v485_v16  ;;  %vm363_vm1 = vcmp.gt.f32.partialorder %v493_v17, 0.0  ;;  %v379_v19 = vmul.f32 0.2, %v493_v17 }
 0x11c   :  { %v239_v20 = vpop.f32.mrb[1].mxu0  ;;  %v271_v21 = vpop.f32.mrb[1].mxu1 }
 0x11d   :  { %v387_v22 = vsel %vm355_vm0, %v485_v16, %v371_v18  ;;  %v395_v23 = vsel %vm363_vm1, %v493_v17, %v379_v19  ;;  %vm353_vm2 = vcmp.gt.f32.partialorder %v239_v20, 0.0  ;;  %v369_v24 = vmul.f32 0.2, %v239_v20  ;;  %v486_v25 = vpop.f32.mrb[2].mxu0  ;;  %v494_v26 = vpop.f32.mrb[2].mxu1 }
 0x11e   :  { %403 = vst [vmem:[#allocation8 + $0x10] sm:$0xff] %v387_v22  ;;  %411 = vst [vmem:[#allocation8 + $0x50] sm:$0xff] %v395_v23  ;;  %vm361_vm3 = vcmp.gt.f32.partialorder %v271_v21, 0.0  ;;  %v377_v27 = vmul.f32 0.2, %v271_v21  ;;  %vm356_vm4 = vcmp.gt.f32.partialorder %v486_v25, 0.0 }
 0x11f   :  { %v372_v28 = vmul.f32 0.2, %v486_v25  ;;  %v385_v29 = vsel %vm353_vm2, %v239_v20, %v369_v24  ;;  %vm364_vm5 = vcmp.gt.f32.partialorder %v494_v26, 0.0  ;;  %v380_v30 = vmul.f32 0.2, %v494_v26  ;;  %v242_v31 = vpop.f32.mrb[3].mxu0 }
 0x120   :  { %v274_v32 = vpop.f32.mrb[3].mxu1  ;;  %401 = vst [vmem:[#allocation8] sm:$0xff] %v385_v29  ;;  %v393_v33 = vsel %vm361_vm3, %v271_v21, %v377_v27  ;;  %vm354_vm6 = vcmp.gt.f32.partialorder %v242_v31, 0.0  ;;  %v370_v35 = vmul.f32 0.2, %v242_v31 }
 0x121   :  { %v388_v34 = vsel %vm356_vm4, %v486_v25, %v372_v28  ;;  %409 = vst [vmem:[#allocation8 + $0x40] sm:$0xff] %v393_v33  ;;  %v396_v36 = vsel %vm364_vm5, %v494_v26, %v380_v30  ;;  %vm362_vm7 = vcmp.gt.f32.partialorder %v274_v32, 0.0  ;;  %v378_v37 = vmul.f32 0.2, %v274_v32 }
 0x122   :  { %404 = vst [vmem:[#allocation8 + $0x18] sm:$0xff] %v388_v34  ;;  %412 = vst [vmem:[#allocation8 + $0x58] sm:$0xff] %v396_v36  ;;  %v386_v38 = vsel %vm354_vm6, %v242_v31, %v370_v35  ;;  %v489_v39 = vpop.f32.mrb[4].mxu0  ;;  %v497_v40 = vpop.f32.mrb[4].mxu1 }
 0x123   :  { %402 = vst [vmem:[#allocation8 + $0x8] sm:$0xff] %v386_v38  ;;  %v394_v41 = vsel %vm362_vm7, %v274_v32, %v378_v37  ;;  %vm359_vm8 = vcmp.gt.f32.partialorder %v489_v39, 0.0  ;;  %v375_v42 = vmul.f32 0.2, %v489_v39  ;;  %vm367_vm9 = vcmp.gt.f32.partialorder %v497_v40, 0.0  ;;  %v255_v43 = vpop.f32.mrb[5].mxu0 }
 0x124   :  { %v287_v44 = vpop.f32.mrb[5].mxu1  ;;  %410 = vst [vmem:[#allocation8 + $0x48] sm:$0xff] %v394_v41  ;;  %v383_v45 = vmul.f32 0.2, %v497_v40  ;;  %vm357_vm10 = vcmp.gt.f32.partialorder %v255_v43, 0.0  ;;  %v490_v49 = vpop.f32.mrb[6].mxu0 }
 0x125   :  { %v373_v46 = vmul.f32 0.2, %v255_v43  ;;  %vm365_vm11 = vcmp.gt.f32.partialorder %v287_v44, 0.0  ;;  %v391_v47 = vsel %vm359_vm8, %v489_v39, %v375_v42  ;;  %v381_v48 = vmul.f32 0.2, %v287_v44  ;;  %v498_v50 = vpop.f32.mrb[6].mxu1 }
 0x126   :  { %407 = vst [vmem:[#allocation8 + $0x30] sm:$0xff] %v391_v47  ;;  %v399_v51 = vsel %vm367_vm9, %v497_v40, %v383_v45  ;;  %vm360_vm12 = vcmp.gt.f32.partialorder %v490_v49, 0.0  ;;  %v376_v53 = vmul.f32 0.2, %v490_v49  ;;  %v258_v54 = vpop.f32.mrb[7].mxu0  ;;  %v290_v55 = vpop.f32.mrb[7].mxu1 }
 0x127   :  { %v389_v52 = vsel %vm357_vm10, %v255_v43, %v373_v46  ;;  %415 = vst [vmem:[#allocation8 + $0x70] sm:$0xff] %v399_v51  ;;  %v397_v56 = vsel %vm365_vm11, %v287_v44, %v381_v48  ;;  %vm368_vm13 = vcmp.gt.f32.partialorder %v498_v50, 0.0  ;;  %v384_v57 = vmul.f32 0.2, %v498_v50 }
 0x128   :  { %405 = vst [vmem:[#allocation8 + $0x20] sm:$0xff] %v389_v52  ;;  %vm358_vm14 = vcmp.gt.f32.partialorder %v258_v54, 0.0  ;;  %413 = vst [vmem:[#allocation8 + $0x60] sm:$0xff] %v397_v56  ;;  %v392_v58 = vsel %vm360_vm12, %v490_v49, %v376_v53  ;;  %v374_v59 = vmul.f32 0.2, %v258_v54  ;;  %vm366_vm15 = vcmp.gt.f32.partialorder %v290_v55, 0.0 }
 0x129   :  { %v382_v60 = vmul.f32 0.2, %v290_v55  ;;  %408 = vst [vmem:[#allocation8 + $0x38] sm:$0xff] %v392_v58  ;;  %v400_v61 = vsel %vm368_vm13, %v498_v50, %v384_v57 }
 0x12a   :  { %416 = vst [vmem:[#allocation8 + $0x78] sm:$0xff] %v400_v61  ;;  %v390_v62 = vsel %vm358_vm14, %v258_v54, %v374_v59 }
 0x12b   :  { %v398_v63 = vsel %vm366_vm15, %v290_v55, %v382_v60  ;;  %406 = vst [vmem:[#allocation8 + $0x28] sm:$0xff] %v390_v62 }
 0x12c   :  { %414 = vst [vmem:[#allocation8 + $0x68] sm:$0xff] %v398_v63 }
 0x12d   :  { %593 = shalt.err (!%p590_p6)
}
 0x12e   :  { %s594_s10 = scalar_lea.hbm %s671_s2, 2048 }
 0x12f   :  { %p595_p7 = scmp.ne.s32.totalorder %s671_s2, %s594_s10  ;;  %p598_p8 = scmp.lt.u32.totalorder %s594_s10, %s671_s2 }
 0x131   :  { %p600_p9 = pnand %p598_p8, %p595_p7 }
 0x133   :  { %603 = shalt.err (!%p600_p9)
}
 0x134   :  { %s615_s15 = smov 128   ;;  %s616_s16 = smov 8  }
 0x135   :  { %428 = dma.vmem_to_hbm [thread:$0]  %s423_s6, 2048, %s671_s2, [#allocation5], %s615_s15, %s615_s15, %s616_s16  }
 0x136   :  { %608 = dma.done.wait [#allocation5], 2048  }
 0x137   :  { %609 = vsyncadd [#allocation5], 4294965248 }
 0x138   :  { %432 = vsyncpa [#allocation4], 1 }
 0x139   :  { %433 = vsyncpa [#allocation7], 1 }
 0x13a   :  { %434 = vsyncpa [#allocation5], 1 }

</bundles_post_ra>
